<compile_context>
chip_gen: v7x
topology: tpu7x:2x2x1
jax: 0.10.0
libtpu: 0.0.40
codegen_flags: <defaults>
</compile_context>

<pallas_src>
import math

import jax
import jax.numpy as jnp
from jax.experimental import pallas as pl
from jax.experimental.pallas import tpu as pltpu


# ---------------------------------------------------------------------------
# Kernels
# ---------------------------------------------------------------------------

def _make_ln_kernel(k, C):
    """Kernel normalizing each length-C segment of a (TR, k*C) tile.

    k == 1 : plain per-row layernorm over the last dim (lane reductions).
    k  > 1 : the last dim packs k consecutive logical rows (lane-dense layout
             for C % 128 != 0); per-segment moments via MXU matmuls against a
             block-diagonal segment-sum matrix S / its transpose ST.
    """
    inv_c = float(1.0 / C)

    if k == 1:
        def kernel(x_ref, w_ref, o_ref):
            xf = x_ref[...].astype(jnp.float32)                        # (TR, C)
            sum_x = jnp.sum(xf, axis=-1, keepdims=True)
            sum_x2 = jnp.sum(xf * xf, axis=-1, keepdims=True)
            mu = sum_x * inv_c
            sigma = jnp.maximum(sum_x2 * inv_c - mu * mu, 0.0)
            inv = jax.lax.rsqrt(sigma + 1e-5)                          # (TR, 1)
            w = w_ref[...].astype(jnp.float32)                         # (1, C)
            # BiasFree semantics: x (not x - mu) is scaled; mu only feeds sigma.
            o_ref[...] = ((xf * inv) * w).astype(o_ref.dtype)
        return kernel

    def kernel(x_ref, w_ref, s_ref, st_ref, o_ref):
        xf = x_ref[...].astype(jnp.float32)                            # (TR, k*C)
        S = s_ref[...]                                                 # (k*C, k)
        ST = st_ref[...]                                               # (k, k*C)
        # Per-segment moments on the MXU (keeps VPU/XLU free; lane-dense tiles).
        sum_x = jnp.dot(xf, S, preferred_element_type=jnp.float32)     # (TR, k)
        sum_x2 = jnp.dot(xf * xf, S, preferred_element_type=jnp.float32)
        mu = sum_x * inv_c
        sigma = jnp.maximum(sum_x2 * inv_c - mu * mu, 0.0)
        inv = jax.lax.rsqrt(sigma + 1e-5)                              # (TR, k)
        # Broadcast per-segment scale back to lane-dense width on the MXU.
        inv_full = jnp.dot(inv, ST, preferred_element_type=jnp.float32)  # (TR, k*C)
        w = w_ref[...].astype(jnp.float32)                             # (1, k*C)
        o_ref[...] = ((xf * inv_full) * w).astype(o_ref.dtype)
    return kernel


# ---------------------------------------------------------------------------
# Sizing helpers
# ---------------------------------------------------------------------------

def _sublane_multiple(itemsize):
    # Packed sublanes per vreg: f32 -> 8, bf16/f16 -> 16, int8/fp8 -> 32.
    return max(8, 32 // max(itemsize, 1))


def _round_up(n, m):
    return ((n + m - 1) // m) * m


def _vmem_capacity_bytes():
    try:
        return int(pltpu.get_tpu_info().vmem_capacity_bytes)
    except Exception:
        return 128 * 1024 * 1024  # v5e / v6e physical VMEM


def _pack_factor(C, rows):
    """Rows packed per lane-dense row: smallest k with (k*C) % 128 == 0."""
    if C % 128 == 0:
        return 1
    k = 128 // math.gcd(C, 128)
    if rows % k == 0:
        return k
    return 1  # fallback: correct, just not lane-dense


def _pick_tile_rows(rows, width, itemsize, tile_budget_bytes):
    """Row-tile size for a (rows, width) slab normalized along `width`."""
    sub = _sublane_multiple(itemsize)
    if rows <= sub:
        return rows  # single full-extent block (exact array dim)
    # Per-row VMEM footprint: 2x-buffered input + 2x-buffered output (native
    # dtype) plus ~3 live full-width f32 temporaries inside the kernel.
    per_row = width * (4 * itemsize + 3 * 4)
    tr = tile_budget_bytes // max(per_row, 1)
    # Cap the *input* tile around 8 MiB; past ~1 MiB/tile the ~0.35 us
    # per-grid-step pipeline overhead is already well amortized.
    tr = min(tr, (8 * 1024 * 1024) // max(width * itemsize, 1))
    tr = max(sub, (tr // sub) * sub)
    tr = min(tr, _round_up(rows, sub))
    # Keep >= 2 grid steps when possible so the "parallel" axis can shard
    # across v7x's two TensorCores (and pipeline on all generations).
    if tr >= rows:
        half = _round_up((rows + 1) // 2, sub)
        if half < rows:
            tr = half
    return tr


# ---------------------------------------------------------------------------
# Wrapper
# ---------------------------------------------------------------------------

def biasfree_layernorm(x, weight, *, tile_rows=None):
    """x: (..., C); weight: (C,). Returns same shape/dtype as x."""
    orig_shape = x.shape
    C = orig_shape[-1]
    x2 = x.reshape(-1, C)
    R = x2.shape[0]
    itemsize = jnp.dtype(x.dtype).itemsize

    # Lane-dense packing: fold k consecutive rows into one row of width k*C
    # (a free row-major reshape) so loads/stores use all 128 lanes.
    k = _pack_factor(C, R)
    W = k * C
    Rp = R // k
    xp = x2.reshape(Rp, W) if k > 1 else x2

    # Per-generation VMEM settings (v7x: 64 MiB physical -> ~48 MiB limit,
    # ~19 MiB tile budget; v5e/v6e: 128 MiB -> 96 MiB limit, ~38 MiB budget).
    cap = _vmem_capacity_bytes()
    vmem_limit = int(min((cap * 3) // 4, 96 * 1024 * 1024))
    tile_budget = int(min((cap * 3) // 10, 40 * 1024 * 1024))

    if tile_rows is None:
        tile_rows = _pick_tile_rows(Rp, W, itemsize, tile_budget)
    grid_rows = pl.cdiv(Rp, tile_rows)

    x_index = lambda i: (i, 0)
    const_index = lambda i: (0, 0)

    # Deepen prefetch only for overhead-dominated shapes (tiny tiles, many steps).
    deep = grid_rows >= 3 and tile_rows * W * itemsize < (1 << 20)
    if deep:
        x_spec = pl.BlockSpec((tile_rows, W), x_index, pipeline_mode=pl.Buffered(3))
    else:
        x_spec = pl.BlockSpec((tile_rows, W), x_index)

    kernel = _make_ln_kernel(k, C)

    if k > 1:
        wp = jnp.tile(weight.reshape(1, C), (1, k))                     # (1, k*C)
        seg = jnp.arange(W, dtype=jnp.int32) // C                       # (W,)
        S = (seg[:, None] == jnp.arange(k, dtype=jnp.int32)[None, :]
             ).astype(jnp.float32)                                      # (W, k)
        ST = S.T                                                        # (k, W)
        in_specs = [
            x_spec,
            pl.BlockSpec((1, W), const_index),
            pl.BlockSpec((W, k), const_index),
            pl.BlockSpec((k, W), const_index),
        ]
        args = (xp, wp, S, ST)
    else:
        wp = weight.reshape(1, C)
        in_specs = [x_spec, pl.BlockSpec((1, W), const_index)]
        args = (xp, wp)

    out = pl.pallas_call(
        kernel,
        out_shape=jax.ShapeDtypeStruct((Rp, W), x.dtype),
        grid_spec=pltpu.PrefetchScalarGridSpec(
            num_scalar_prefetch=0,
            grid=(grid_rows,),
            in_specs=in_specs,
            out_specs=pl.BlockSpec((tile_rows, W), x_index),
        ),
        compiler_params=pltpu.CompilerParams(
            dimension_semantics=("parallel",),
            vmem_limit_bytes=vmem_limit,
        ),
    )(*args)

    return out.reshape(orig_shape)


# ---------------------------------------------------------------------------
# Reference + smoke test
# ---------------------------------------------------------------------------

def _reference(x, weight):
    sigma = jnp.var(x, axis=-1, keepdims=True)  # unbiased=False
    return x / jnp.sqrt(sigma + 1e-5) * weight


if __name__ == "__main__":
    key = jax.random.PRNGKey(0)
    B, N, C = 2, 8, 32  # batch=2, seq=8, hidden=32
    x = jax.random.normal(key, (B, N, C), dtype=jnp.float32)

    # Deterministic parameter init, as in the module: weight = ones(C)
    weight = jnp.ones((C,), dtype=jnp.float32)

    out = biasfree_layernorm(x, weight)
    jax.block_until_ready(out)

    ref = _reference(x, weight)
    assert out.shape == x.shape and out.dtype == x.dtype
    assert jnp.allclose(out, ref, atol=1e-4, rtol=1e-4)

    print("KERNEL_OK")
</pallas_src>

<mosaic_0001>
module attributes {stable_mosaic.version = 11 : i64} {
  func.func @kernel(%arg0: i32, %arg1: memref<4x128xf32, #tpu.memory_space<vmem>>, %arg2: memref<1x128xf32, #tpu.memory_space<vmem>>, %arg3: memref<128x4xf32, #tpu.memory_space<vmem>>, %arg4: memref<4x128xf32, #tpu.memory_space<vmem>>, %arg5: memref<4x128xf32, #tpu.memory_space<vmem>>) attributes {dimension_semantics = [#tpu.dimension_semantics<parallel>], iteration_bounds = array<i64: 1>, scalar_prefetch = 0 : i64, scratch_operands = 0 : i64, tpu.core_type = #tpu.core_type<tc>, window_params = [{transform_indices = @transform_0, window_bounds = array<i64: 4, 128>}, {pipeline_mode = #tpu.pipeline_mode<synchronous>, transform_indices = @transform_1, window_bounds = array<i64: 1, 128>}, {pipeline_mode = #tpu.pipeline_mode<synchronous>, transform_indices = @transform_2, window_bounds = array<i64: 128, 4>}, {pipeline_mode = #tpu.pipeline_mode<synchronous>, transform_indices = @transform_3, window_bounds = array<i64: 4, 128>}, {transform_indices = @transform_4, window_bounds = array<i64: 4, 128>}]} {
    %c0 = arith.constant 0 : index
    %c0_0 = arith.constant 0 : index
    %0 = vector.load %arg1[%c0, %c0_0] : memref<4x128xf32, #tpu.memory_space<vmem>>, vector<4x128xf32>
    %c0_1 = arith.constant 0 : index
    %c0_2 = arith.constant 0 : index
    %1 = vector.load %arg3[%c0_1, %c0_2] : memref<128x4xf32, #tpu.memory_space<vmem>>, vector<128x4xf32>
    %c0_3 = arith.constant 0 : index
    %c0_4 = arith.constant 0 : index
    %2 = vector.load %arg4[%c0_3, %c0_4] : memref<4x128xf32, #tpu.memory_space<vmem>>, vector<4x128xf32>
    %cst = arith.constant dense<0.000000e+00> : vector<4x4xf32>
    %3 = tpu.matmul %0, %1, %cst {dimension_numbers = #tpu.dot_dimension_numbers<[1], [0], [0], [1], [0, 0, 1, 1], [], []>} : vector<4x128xf32>, vector<128x4xf32>, vector<4x4xf32> -> vector<4x4xf32>
    %4 = arith.mulf %0, %0 : vector<4x128xf32>
    %cst_5 = arith.constant dense<0.000000e+00> : vector<4x4xf32>
    %5 = tpu.matmul %4, %1, %cst_5 {dimension_numbers = #tpu.dot_dimension_numbers<[1], [0], [0], [1], [0, 0, 1, 1], [], []>} : vector<4x128xf32>, vector<128x4xf32>, vector<4x4xf32> -> vector<4x4xf32>
    %cst_6 = arith.constant 3.125000e-02 : f32
    %6 = vector.broadcast %cst_6 : f32 to vector<4x4xf32>
    %7 = arith.mulf %3, %6 : vector<4x4xf32>
    %cst_7 = arith.constant 3.125000e-02 : f32
    %8 = vector.broadcast %cst_7 : f32 to vector<4x4xf32>
    %9 = arith.mulf %5, %8 : vector<4x4xf32>
    %10 = arith.mulf %7, %7 : vector<4x4xf32>
    %11 = arith.subf %9, %10 : vector<4x4xf32>
    %cst_8 = arith.constant 0.000000e+00 : f32
    %12 = vector.broadcast %cst_8 : f32 to vector<4x4xf32>
    %13 = arith.maximumf %11, %12 : vector<4x4xf32>
    %cst_9 = arith.constant 9.99999974E-6 : f32
    %14 = vector.broadcast %cst_9 : f32 to vector<4x4xf32>
    %15 = arith.addf %13, %14 : vector<4x4xf32>
    %16 = math.rsqrt %15 : vector<4x4xf32>
    %cst_10 = arith.constant dense<0.000000e+00> : vector<4x128xf32>
    %17 = tpu.matmul %16, %2, %cst_10 {dimension_numbers = #tpu.dot_dimension_numbers<[1], [0], [0], [1], [0, 0, 1, 1], [], []>} : vector<4x4xf32>, vector<4x128xf32>, vector<4x128xf32> -> vector<4x128xf32>
    %c0_11 = arith.constant 0 : index
    %c0_12 = arith.constant 0 : index
    %18 = vector.load %arg2[%c0_11, %c0_12] : memref<1x128xf32, #tpu.memory_space<vmem>>, vector<1x128xf32>
    %19 = arith.mulf %0, %17 : vector<4x128xf32>
    %20 = vector.broadcast %18 : vector<1x128xf32> to vector<4x128xf32>
    %21 = arith.mulf %19, %20 : vector<4x128xf32>
    %c0_13 = arith.constant 0 : index
    %c0_14 = arith.constant 0 : index
    %22 = vector.load %arg5[%c0_13, %c0_14] : memref<4x128xf32, #tpu.memory_space<vmem>>, vector<4x128xf32>
    tpu.vector_store %arg5[%c0_13, %c0_14], %21 {strides = array<i32>} : memref<4x128xf32, #tpu.memory_space<vmem>>, vector<4x128xf32>,
    return
  }
  func.func @transform_0(%arg0: i32) -> (i32, i32) {
    %c0_i32 = arith.constant 0 : i32
    %c0_i32_0 = arith.constant 0 : i32
    return %arg0, %c0_i32 : i32, i32
  }
  func.func @transform_1(%arg0: i32) -> (i32, i32) {
    %c0_i32 = arith.constant 0 : i32
    %c0_i32_0 = arith.constant 0 : i32
    %c0_i32_1 = arith.constant 0 : i32
    return %c0_i32, %c0_i32_0 : i32, i32
  }
  func.func @transform_2(%arg0: i32) -> (i32, i32) {
    %c0_i32 = arith.constant 0 : i32
    %c0_i32_0 = arith.constant 0 : i32
    %c0_i32_1 = arith.constant 0 : i32
    return %c0_i32, %c0_i32_0 : i32, i32
  }
  func.func @transform_3(%arg0: i32) -> (i32, i32) {
    %c0_i32 = arith.constant 0 : i32
    %c0_i32_0 = arith.constant 0 : i32
    %c0_i32_1 = arith.constant 0 : i32
    return %c0_i32, %c0_i32_0 : i32, i32
  }
  func.func @transform_4(%arg0: i32) -> (i32, i32) {
    %c0_i32 = arith.constant 0 : i32
    %c0_i32_0 = arith.constant 0 : i32
    return %arg0, %c0_i32 : i32, i32
  }
}

</mosaic_0001>

<bundles_post_ra>
// kernel: tpu_custom_call.1
= control target key start
LH: loop header
LB: loop body
LE: loop exit
PB: predicated region body
PF: predicated region fallthrough
CT: control target
= control target key end

     0   :  { %9 = vsyncpa [#allocation3], 0  ;;  %s728_s0 = inlined_call_operand.hbm [shape: f32[4,128], index: 0, kind: input, shape index: {}]   ;;  %s729_s1 = inlined_call_operand.hbm [shape: f32[1,128], index: 1, kind: input, shape index: {}]   ;;  %s730_s2 = inlined_call_operand.hbm [shape: f32[128,4], index: 2, kind: input, shape index: {}]   ;;  %s731_s3 = inlined_call_operand.hbm [shape: f32[4,128], index: 3, kind: input, shape index: {}]   ;;  %s732_s4 = inlined_call_operand.hbm [shape: f32[4,128], index: 4, kind: output, shape index: {}]  }
   0x1   :  { %10 = vsyncpa [#allocation6], 0 }
   0x2   :  { %11 = vsyncpa [#allocation9], 0 }
   0x3   :  { %12 = vsyncpa [#allocation4], 0  ;;  %s630_s15 = smov [#allocation5]   ;;  %s631_s17 = smov [#allocation2]  }
   0x4   :  { %s29_s16 = sshll.u32 %s630_s15, 4  ;;  %s19_s18 = sshll.u32 %s631_s17, 4  ;;  %s30_s16 = int_to_ptr.vmem [resolvable:$true] %s29_s16  ;;  %s20_s18 = int_to_ptr.vmem [resolvable:$true] %s19_s18 }
   0x5   :  { %s512_s21 = scalar_lea.hbm %s729_s1, 16 }
   0x6   :  { %p513_p0 = scmp.ne.s32.totalorder %s729_s1, %s512_s21  ;;  %p516_p1 = scmp.lt.u32.totalorder %s512_s21, %s729_s1 }
   0x8   :  { %p518_p2 = pnand %p516_p1, %p513_p0 }
   0xa   :  { %521 = shalt.err (!%p518_p2)
}
   0xb   :  { %s522_s26 = scalar_lea.vmem %s30_s16, 16  ;;  %s526_s27 = scalar_lea.vmem %s30_s16, 32 }
   0xc   :  { %p523_p3 = scmp.ne.s32.totalorder %s30_s16, %s522_s26  ;;  %p527_p4 = scmp.lt.s32.totalorder %s30_s16, %s30_s16 }
   0xd   :  { %p528_p5 = scmp.lt.s32.totalorder %s526_s27, %s522_s26 }
   0xf   :  { %p529_p6 = por %p528_p5, %p527_p4 }
  0x11   :  { %p530_p7 = pnand %p529_p6, %p523_p3 }
  0x13   :  { %533 = shalt.err (!%p530_p7)
}
  0x14   :  { %32 = dma.hbm_to_vmem [thread:$0]  %s729_s1, 16, %s30_s16, [#allocation6]  }
  0x15   :  { %s534_s6 = scalar_lea.hbm %s728_s0, 64 }
  0x16   :  { %p535_p8 = scmp.ne.s32.totalorder %s728_s0, %s534_s6  ;;  %p538_p9 = scmp.lt.u32.totalorder %s534_s6, %s728_s0 }
  0x18   :  { %p540_p10 = pnand %p538_p9, %p535_p8 }
  0x1a   :  { %543 = shalt.err (!%p540_p10)
}
  0x1b   :  { %s544_s11 = scalar_lea.vmem %s20_s18, 64  ;;  %p549_p12 = scmp.lt.s32.totalorder %s20_s18, %s20_s18 }
  0x1c   :  { %p545_p11 = scmp.ne.s32.totalorder %s20_s18, %s544_s11  ;;  %p550_p13 = scmp.lt.s32.totalorder %s544_s11, %s544_s11 }
  0x1e   :  { %p551_p0 = por %p550_p13, %p549_p12 }
  0x20   :  { %p552_p1 = pnand %p551_p0, %p545_p11 }
  0x22   :  { %555 = shalt.err (!%p552_p1)
}
  0x23   :  { %22 = dma.hbm_to_vmem [thread:$0]  %s728_s0, 64, %s20_s18, [#allocation3]  }
  0x24   :  { %s632_s13 = smov [#allocation7]   ;;  %s556_s17 = scalar_lea.hbm %s730_s2, 2048 }
  0x25   :  { %s38_s14 = sshll.u32 %s632_s13, 4  ;;  %p557_p2 = scmp.ne.s32.totalorder %s730_s2, %s556_s17  ;;  %s39_s14 = int_to_ptr.vmem [resolvable:$true] %s38_s14 }
  0x26   :  { %p560_p3 = scmp.lt.u32.totalorder %s556_s17, %s730_s2 }
  0x28   :  { %p562_p4 = pnand %p560_p3, %p557_p2 }
  0x2a   :  { %565 = shalt.err (!%p562_p4)
}
  0x2b   :  { %s566_s23 = scalar_lea.vmem %s39_s14, 2048  ;;  %p571_p6 = scmp.lt.s32.totalorder %s39_s14, %s39_s14 }
  0x2c   :  { %p567_p5 = scmp.ne.s32.totalorder %s39_s14, %s566_s23  ;;  %p572_p7 = scmp.lt.s32.totalorder %s566_s23, %s566_s23 }
  0x2e   :  { %p573_p8 = por %p572_p7, %p571_p6 }
  0x30   :  { %p574_p9 = pnand %p573_p8, %p567_p5 }
  0x32   :  { %577 = shalt.err (!%p574_p9)
}
  0x33   :  { %s633_s0 = smov 128   ;;  %s634_s18 = smov 8  }
  0x34   :  { %44 = dma.hbm_to_vmem [thread:$0]  %s730_s2, 2048, %s39_s14, [#allocation6], %s633_s0, %s633_s0, %s634_s18  }
  0x35   :  { %s635_s26 = smov [#allocation8]   ;;  %s578_s30 = scalar_lea.hbm %s731_s3, 64 }
  0x36   :  { %s51_s27 = sshll.u32 %s635_s26, 4  ;;  %p579_p10 = scmp.ne.s32.totalorder %s731_s3, %s578_s30  ;;  %s52_s27 = int_to_ptr.vmem [resolvable:$true] %s51_s27 }
  0x37   :  { %p582_p11 = scmp.lt.u32.totalorder %s578_s30, %s731_s3 }
  0x39   :  { %p584_p12 = pnand %p582_p11, %p579_p10 }
  0x3b   :  { %587 = shalt.err (!%p584_p12)
}
  0x3c   :  { %s588_s9 = scalar_lea.vmem %s52_s27, 64  ;;  %p593_p0 = scmp.lt.s32.totalorder %s52_s27, %s52_s27 }
  0x3d   :  { %p589_p13 = scmp.ne.s32.totalorder %s52_s27, %s588_s9  ;;  %p594_p1 = scmp.lt.s32.totalorder %s588_s9, %s588_s9 }
  0x3f   :  { %p595_p2 = por %p594_p1, %p593_p0 }
  0x41   :  { %p596_p3 = pnand %p595_p2, %p589_p13 }
  0x43   :  { %599 = shalt.err (!%p596_p3)
}
  0x44   :  { %54 = dma.hbm_to_vmem [thread:$0]  %s731_s3, 64, %s52_s27, [#allocation9]  }
  0x45   :  { %622 = dma.done.wait [#allocation3], 64  }
  0x46   :  { %623 = vsyncadd [#allocation3], 4294967232 }
  0x47   :  { %624 = dma.done.wait [#allocation6], 2064  }
  0x48   :  { %625 = vsyncadd [#allocation6], 4294965232 }
  0x49   :  { %626 = dma.done.wait [#allocation9], 64  }
  0x4a   :  { %627 = vsyncadd [#allocation9], 4294967232  ;;  %v636_v0 = vmov 0.0|0.0   ;;  %vm637_vm0 = vmmov 0   ;;  %v638_v1 = vmov 0.0   ;;  %v68_v2 = vld [vmem:[#allocation7] sm:$0xff] }
  0x4b   :  { %452 = vmatprep.subr.bf16.mxu0 %v636_v0  ;;  %476 = vmatprep.subr.bf16.mxu1 %v636_v0  ;;  %v69_v3 = vld [vmem:[#allocation7 + $0x8] sm:$0xff]  ;;  %v70_v4 = vld [vmem:[#allocation7 + $0x10] sm:$0xff]  ;;  %v71_v6 = vld [vmem:[#allocation7 + $0x18] sm:$0xff]  ;;  %vm237_vm1 = vcmask 1043456   ;;  %vm233_vm2 = vcmask 31744   ;;  %s639_s3 = smov [#allocation10]  }
  0x4c   :  { %409 = vmatprep.mubr.msk.f32.mxu0 %vm637_vm0, %v638_v1  ;;  %444 = vmatprep.mubr.msk.f32.mxu1 %vm637_vm0, %v638_v1  ;;  %v453_v5 = vpack.c.bf16 %v69_v3, %v68_v2  ;;  %v456_v7 = vpack.c.bf16 %v71_v6, %v70_v4  ;;  %v72_v8 = vld [vmem:[#allocation7 + $0x20] sm:$0xff]  ;;  %v73_v9 = vld [vmem:[#allocation7 + $0x28] sm:$0xff]  ;;  %v74_v11 = vld [vmem:[#allocation7 + $0x30] sm:$0xff]  ;;  %s327_s11 = sshll.u32 %s639_s3, 4  ;;  %s328_s11 = int_to_ptr.vmem [resolvable:$true] %s327_s11 }
  0x4d   :  { %v459_v10 = vpack.c.bf16 %v73_v9, %v72_v8  ;;  %v75_v12 = vld [vmem:[#allocation7 + $0x38] sm:$0xff]  ;;  %v76_v14 = vld [vmem:[#allocation7 + $0x40] sm:$0xff]  ;;  %v77_v15 = vld [vmem:[#allocation7 + $0x48] sm:$0xff]  ;;  %s600_s1 = scalar_lea.vmem %s328_s11, 64  ;;  %p605_p5 = scmp.lt.s32.totalorder %s328_s11, %s328_s11 }
  0x4e   :  { %454 = vmatpush3.bf16.msra.mxu0 %v453_v5  ;;  %478 = vmatpush3.bf16.msra.mxu1 %v453_v5  ;;  %v462_v13 = vpack.c.bf16 %v75_v12, %v74_v11  ;;  %v465_v16 = vpack.c.bf16 %v77_v15, %v76_v14  ;;  %v78_v17 = vld [vmem:[#allocation7 + $0x50] sm:$0xff]  ;;  %v79_v18 = vld [vmem:[#allocation7 + $0x58] sm:$0xff]  ;;  %v80_v20 = vld [vmem:[#allocation7 + $0x60] sm:$0xff]  ;;  %p601_p4 = scmp.ne.s32.totalorder %s328_s11, %s600_s1  ;;  %p606_p6 = scmp.lt.s32.totalorder %s600_s1, %s600_s1 }
  0x4f   :  { %455 = vmatprep.subr.bf16.mxu0 %v636_v0  ;;  %479 = vmatprep.subr.bf16.mxu1 %v636_v0  ;;  %v468_v19 = vpack.c.bf16 %v79_v18, %v78_v17  ;;  %v81_v21 = vld [vmem:[#allocation7 + $0x68] sm:$0xff]  ;;  %v82_v23 = vld [vmem:[#allocation7 + $0x70] sm:$0xff]  ;;  %v83_v24 = vld [vmem:[#allocation7 + $0x78] sm:$0xff] }
  0x50   :  { %v471_v22 = vpack.c.bf16 %v81_v21, %v80_v20  ;;  %v474_v25 = vpack.c.bf16 %v83_v24, %v82_v23  ;;  %v67_v26 = vld [vmem:[#allocation2] sm:$0xf]  ;;  %v84_v28 = vld [vmem:[#allocation8] sm:$0xf]  ;;  %v340_v41 = vld [vmem:[#allocation5] ss:$0 sm:$0xff]  ;;  %p607_p7 = por %p606_p6, %p605_p5 }
  0x51   :  { %v155_v27 = vmul.f32 %v67_v26, %v67_v26 }
  0x52   :  { %457 = vmatpush3.bf16.msra.mxu0 %v456_v7  ;;  %481 = vmatpush3.bf16.msra.mxu1 %v456_v7  ;;  %p608_p8 = pnand %p607_p7, %p601_p4 }
  0x53   :  { %458 = vmatprep.subr.bf16.mxu0 %v636_v0  ;;  %482 = vmatprep.subr.bf16.mxu1 %v636_v0 }
  0x56   :  { %460 = vmatpush3.bf16.msra.mxu0 %v459_v10  ;;  %484 = vmatpush3.bf16.msra.mxu1 %v459_v10 }
  0x57   :  { %461 = vmatprep.subr.bf16.mxu0 %v636_v0  ;;  %485 = vmatprep.subr.bf16.mxu1 %v636_v0 }
  0x5a   :  { %463 = vmatpush3.bf16.msra.mxu0 %v462_v13  ;;  %487 = vmatpush3.bf16.msra.mxu1 %v462_v13 }
  0x5b   :  { %464 = vmatprep.subr.bf16.mxu0 %v636_v0  ;;  %488 = vmatprep.subr.bf16.mxu1 %v636_v0 }
  0x5e   :  { %466 = vmatpush3.bf16.msra.mxu0 %v465_v16  ;;  %490 = vmatpush3.bf16.msra.mxu1 %v465_v16 }
  0x5f   :  { %467 = vmatprep.subr.bf16.mxu0 %v636_v0  ;;  %491 = vmatprep.subr.bf16.mxu1 %v636_v0 }
  0x62   :  { %469 = vmatpush3.bf16.msra.mxu0 %v468_v19  ;;  %493 = vmatpush3.bf16.msra.mxu1 %v468_v19 }
  0x63   :  { %470 = vmatprep.subr.bf16.mxu0 %v636_v0  ;;  %494 = vmatprep.subr.bf16.mxu1 %v636_v0 }
  0x66   :  { %472 = vmatpush3.bf16.msra.mxu0 %v471_v22  ;;  %496 = vmatpush3.bf16.msra.mxu1 %v471_v22 }
  0x67   :  { %473 = vmatprep.subr.bf16.mxu0 %v636_v0  ;;  %497 = vmatprep.subr.bf16.mxu1 %v636_v0 }
  0x6a   :  { %475 = vmatpush3.bf16.msra.mxu0 %v474_v25  ;;  %499 = vmatpush3.bf16.msra.mxu1 %v474_v25 }
  0x6b   :  { %447 = vmatprep.subr.mxu0 %v638_v1 }
  0x6d   :  { %410 = vmatmul.mubr.f32.vlgmr.msra.gmra.mrb[0].mxu0 %v67_v26  ;;  %445 = vmatmul.mubr.f32.vlgmr.msra.gmra.mrb[0].mxu1 %v155_v27 }
  0x6e   :  { %449 = vmatprep.mubr.msk.f32.mxu0 %vm637_vm0, %v638_v1  ;;  %448 = vmatpush3.msk.msra.mxu0 %vm237_vm1, %v84_v28 }
 0x140   :  { %v151_v29 = vpop.f32.mrb[0].mxu0  ;;  %v222_v30 = vpop.f32.mrb[0].mxu1 }
 0x141   :  { %v226_v31 = vmul.f32 0.03125, %v151_v29  ;;  %v411_v32 = vpop.f32.mrb[1].mxu0  ;;  %v227_v33 = vmul.f32 0.03125, %v222_v30  ;;  %v446_v34 = vpop.f32.mrb[1].mxu1 }
 0x143   :  { %v228_v35 = vmul.f32 %v226_v31, %v226_v31 }
 0x145   :  { %v229_v36 = vsub.f32 %v227_v33, %v228_v35 }
 0x147   :  { %v230_v37 = vmax.f32 %v229_v36, 0.0 }
 0x149   :  { %v231_v38 = vadd.f32 1e-05, %v230_v37 }
 0x14b   :  { %510 = vrsqrt.f32 %v231_v38 }
 0x155   :  { %v511_v39 = vpop.eup %510 }
 0x156   :  { %450 = vmatmul.mubr.msk.f32.vlgmr.msra.gmra.mrb[2].mxu0 %vm233_vm2, %v511_v39 }
 0x229   :  { %v307_v40 = vpop.f32.mrb[2].mxu0 }
 0x22a   :  { %v312_v42 = vmul.f32 %v307_v40, %v67_v26  ;;  %v451_v43 = vpop.f32.mrb[3].mxu0 }
 0x22c   :  { %v319_v44 = vmul.f32 %v340_v41, %v312_v42 }
 0x22e   :  { %320 = vst [vmem:[#allocation10] sm:$0xf] %v319_v44 }
 0x22f   :  { %611 = shalt.err (!%p608_p8)
}
 0x230   :  { %s612_s14 = scalar_lea.hbm %s732_s4, 64 }
 0x231   :  { %p613_p9 = scmp.ne.s32.totalorder %s732_s4, %s612_s14  ;;  %p616_p10 = scmp.lt.u32.totalorder %s612_s14, %s732_s4 }
 0x233   :  { %p618_p11 = pnand %p616_p10, %p613_p9 }
 0x235   :  { %621 = shalt.err (!%p618_p11)
}
 0x236   :  { %330 = dma.vmem_to_hbm [thread:$0]  %s328_s11, 64, %s732_s4, [#allocation4]  }
 0x237   :  { %628 = dma.done.wait [#allocation4], 64  }
 0x238   :  { %629 = vsyncadd [#allocation4], 4294967232 }
 0x239   :  { %334 = vsyncpa [#allocation3], 1 }
 0x23a   :  { %335 = vsyncpa [#allocation6], 1 }
 0x23b   :  { %336 = vsyncpa [#allocation9], 1 }
 0x23c   :  { %337 = vsyncpa [#allocation4], 1 }

</bundles_post_ra>
